<compile_context>
chip_gen: v6e
topology: v6e:2x2x1
jax: 0.10.0
libtpu: 0.0.40
codegen_flags: <defaults>
</compile_context>

<pallas_src>
import jax
import jax.numpy as jnp
from jax.experimental import pallas as pl
from jax.experimental.pallas import tpu as pltpu


def _round_up(n, m):
    return ((n + m - 1) // m) * m


def dqn_kernel(x_ref, w1_ref, b1_ref, w2_ref, b2_ref, w3_ref, b3_ref, o_ref):
    # One batch tile per grid step: three MXU matmuls + VPU relu, f32 accumulation.
    x = x_ref[...]

    h1 = jnp.dot(x, w1_ref[...], preferred_element_type=jnp.float32) + b1_ref[...]
    h1 = jnp.maximum(h1, 0.0)

    h2 = jnp.dot(h1, w2_ref[...], preferred_element_type=jnp.float32) + b2_ref[...]
    h2 = jnp.maximum(h2, 0.0)

    out = jnp.dot(h2, w3_ref[...], preferred_element_type=jnp.float32) + b3_ref[...]
    o_ref[...] = out.astype(o_ref.dtype)


def prepare_params(params):
    """Pad the final layer to a lane-dense (multiple of 128) output ONCE.

    Call this outside the training/inference hot loop; `dqn_forward` then takes
    the prepared params plus the true n_actions to slice back.
    """
    w1, b1, w2, b2, w3, b3 = params
    hidden = w3.shape[0]
    n_actions = w3.shape[1]
    n_out = max(128, _round_up(n_actions, 128))
    if n_out != n_actions:
        w3p = jnp.zeros((hidden, n_out), w3.dtype).at[:, :n_actions].set(w3)
        b3p = jnp.zeros((1, n_out), b3.dtype).at[:, :n_actions].set(b3)
    else:
        w3p, b3p = w3, b3
    return (w1, b1, w2, b2, w3p, b3p), n_actions


def dqn_forward(x, prepared_params, n_actions, *, tile_b=512):
    """Batched DQN forward.  x: (B, n_obs) f32.  Returns (B, n_actions) f32."""
    w1, b1, w2, b2, w3p, b3p = prepared_params
    B, n_obs = x.shape
    hidden = w1.shape[1]
    n_out = w3p.shape[1]

    # ---- Batch tiling: sublane-aligned tile, pad B up to a tile multiple. ----
    tile_b = min(tile_b, max(8, _round_up(B, 8)))
    tile_b = _round_up(tile_b, 8)
    b_pad = _round_up(B, tile_b)
    if b_pad != B:
        x = jnp.pad(x, ((0, b_pad - B), (0, 0)))

    grid = (b_pad // tile_b,)

    out = pl.pallas_call(
        dqn_kernel,
        out_shape=jax.ShapeDtypeStruct((b_pad, n_out), jnp.float32),
        grid_spec=pltpu.PrefetchScalarGridSpec(
            num_scalar_prefetch=0,
            grid=grid,
            in_specs=[
                # Activation stream: one (tile_b, n_obs) tile per grid step.
                pl.BlockSpec((tile_b, n_obs), lambda i: (i, 0)),
                # Weights/biases: same block every step -> stay VMEM-resident.
                pl.BlockSpec((n_obs, hidden), lambda i: (0, 0)),
                pl.BlockSpec((1, hidden), lambda i: (0, 0)),
                pl.BlockSpec((hidden, hidden), lambda i: (0, 0)),
                pl.BlockSpec((1, hidden), lambda i: (0, 0)),
                pl.BlockSpec((hidden, n_out), lambda i: (0, 0)),
                pl.BlockSpec((1, n_out), lambda i: (0, 0)),
            ],
            out_specs=pl.BlockSpec((tile_b, n_out), lambda i: (i, 0)),
        ),
        compiler_params=pltpu.CompilerParams(
            # Batch axis is embarrassingly parallel: shards across v7x's 2 TCs.
            dimension_semantics=("parallel",),
        ),
    )(x, w1, b1, w2, b2, w3p, b3p)

    # Slice off batch padding and the lane padding of the final layer.
    return out[:B, :n_actions]
    # TODO(synk): for a persistent RL loop, cast weights to bf16 (v6e/v7x MXU)
    # and/or keep them pinned across calls (cross-call prefetch) instead of
    # re-DMAing once per pallas_call.


def init_dqn_params(key, n_observations, n_actions, hidden=128):
    """Deterministic init mimicking PyTorch's default Linear init (U(-1/sqrt(fan_in), +))."""
    ks = jax.random.split(key, 6)

    def linear(kw, kb, fan_in, fan_out):
        bound = 1.0 / jnp.sqrt(jnp.float32(fan_in))
        w = jax.random.uniform(kw, (fan_in, fan_out), jnp.float32, -bound, bound)
        b = jax.random.uniform(kb, (1, fan_out), jnp.float32, -bound, bound)
        return w, b

    w1, b1 = linear(ks[0], ks[1], n_observations, hidden)
    w2, b2 = linear(ks[2], ks[3], hidden, hidden)
    w3, b3 = linear(ks[4], ks[5], hidden, n_actions)
    return (w1, b1, w2, b2, w3, b3)


def dqn_reference(x, params):
    w1, b1, w2, b2, w3, b3 = params
    h1 = jnp.maximum(x @ w1 + b1, 0.0)
    h2 = jnp.maximum(h1 @ w2 + b2, 0.0)
    return h2 @ w3 + b3


if __name__ == "__main__":
    # CartPole-style shapes: 4 observations, 2 actions.  Batch large enough to
    # exercise the batch grid (2 tiles of 128), still small and fast.
    B, n_observations, n_actions = 256, 4, 2
    TILE_B = 128

    key = jax.random.PRNGKey(0)
    k_params, k_x = jax.random.split(key)
    params = init_dqn_params(k_params, n_observations, n_actions)
    x = jax.random.normal(k_x, (B, n_observations), dtype=jnp.float32)

    # Pad the final layer to lane-dense output once, outside the hot path.
    prepared, n_act = prepare_params(params)

    fwd = jax.jit(
        lambda x, p: dqn_forward(x, p, n_act, tile_b=TILE_B)
    )
    out = fwd(x, prepared)
    out = jax.block_until_ready(out)

    ref = dqn_reference(x, params)
    assert out.shape == (B, n_actions), out.shape
    assert jnp.allclose(out, ref, atol=1e-4, rtol=1e-4), "mismatch vs reference"

    print("KERNEL_OK")
</pallas_src>

<mosaic_0001>
module attributes {stable_mosaic.version = 11 : i64} {
  func.func @dqn_kernel(%arg0: i32, %arg1: memref<128x4xf32, #tpu.memory_space<vmem>>, %arg2: memref<4x128xf32, #tpu.memory_space<vmem>>, %arg3: memref<1x128xf32, #tpu.memory_space<vmem>>, %arg4: memref<128x128xf32, #tpu.memory_space<vmem>>, %arg5: memref<1x128xf32, #tpu.memory_space<vmem>>, %arg6: memref<128x128xf32, #tpu.memory_space<vmem>>, %arg7: memref<1x128xf32, #tpu.memory_space<vmem>>, %arg8: memref<128x128xf32, #tpu.memory_space<vmem>>) attributes {dimension_semantics = [#tpu.dimension_semantics<parallel>], iteration_bounds = array<i64: 2>, scalar_prefetch = 0 : i64, scratch_operands = 0 : i64, tpu.core_type = #tpu.core_type<tc>, window_params = [{transform_indices = @transform_0, window_bounds = array<i64: 128, 4>}, {pipeline_mode = #tpu.pipeline_mode<synchronous>, transform_indices = @transform_1, window_bounds = array<i64: 4, 128>}, {pipeline_mode = #tpu.pipeline_mode<synchronous>, transform_indices = @transform_2, window_bounds = array<i64: 1, 128>}, {pipeline_mode = #tpu.pipeline_mode<synchronous>, transform_indices = @transform_3, window_bounds = array<i64: 128, 128>}, {pipeline_mode = #tpu.pipeline_mode<synchronous>, transform_indices = @transform_4, window_bounds = array<i64: 1, 128>}, {pipeline_mode = #tpu.pipeline_mode<synchronous>, transform_indices = @transform_5, window_bounds = array<i64: 128, 128>}, {pipeline_mode = #tpu.pipeline_mode<synchronous>, transform_indices = @transform_6, window_bounds = array<i64: 1, 128>}, {transform_indices = @transform_7, window_bounds = array<i64: 128, 128>}]} {
    %c0 = arith.constant 0 : index
    %c0_0 = arith.constant 0 : index
    %0 = vector.load %arg1[%c0, %c0_0] : memref<128x4xf32, #tpu.memory_space<vmem>>, vector<128x4xf32>
    %c0_1 = arith.constant 0 : index
    %c0_2 = arith.constant 0 : index
    %1 = vector.load %arg2[%c0_1, %c0_2] : memref<4x128xf32, #tpu.memory_space<vmem>>, vector<4x128xf32>
    %cst = arith.constant dense<0.000000e+00> : vector<128x128xf32>
    %2 = tpu.matmul %0, %1, %cst {dimension_numbers = #tpu.dot_dimension_numbers<[1], [0], [0], [1], [0, 0, 1, 1], [], []>} : vector<128x4xf32>, vector<4x128xf32>, vector<128x128xf32> -> vector<128x128xf32>
    %c0_3 = arith.constant 0 : index
    %c0_4 = arith.constant 0 : index
    %3 = vector.load %arg3[%c0_3, %c0_4] : memref<1x128xf32, #tpu.memory_space<vmem>>, vector<1x128xf32>
    %4 = vector.broadcast %3 : vector<1x128xf32> to vector<128x128xf32>
    %5 = arith.addf %2, %4 : vector<128x128xf32>
    %cst_5 = arith.constant 0.000000e+00 : f32
    %6 = vector.broadcast %cst_5 : f32 to vector<128x128xf32>
    %7 = arith.maximumf %5, %6 : vector<128x128xf32>
    %c0_6 = arith.constant 0 : index
    %c0_7 = arith.constant 0 : index
    %8 = vector.load %arg4[%c0_6, %c0_7] : memref<128x128xf32, #tpu.memory_space<vmem>>, vector<128x128xf32>
    %cst_8 = arith.constant dense<0.000000e+00> : vector<128x128xf32>
    %9 = tpu.matmul %7, %8, %cst_8 {dimension_numbers = #tpu.dot_dimension_numbers<[1], [0], [0], [1], [0, 0, 1, 1], [], []>} : vector<128x128xf32>, vector<128x128xf32>, vector<128x128xf32> -> vector<128x128xf32>
    %c0_9 = arith.constant 0 : index
    %c0_10 = arith.constant 0 : index
    %10 = vector.load %arg5[%c0_9, %c0_10] : memref<1x128xf32, #tpu.memory_space<vmem>>, vector<1x128xf32>
    %11 = vector.broadcast %10 : vector<1x128xf32> to vector<128x128xf32>
    %12 = arith.addf %9, %11 : vector<128x128xf32>
    %cst_11 = arith.constant 0.000000e+00 : f32
    %13 = vector.broadcast %cst_11 : f32 to vector<128x128xf32>
    %14 = arith.maximumf %12, %13 : vector<128x128xf32>
    %c0_12 = arith.constant 0 : index
    %c0_13 = arith.constant 0 : index
    %15 = vector.load %arg6[%c0_12, %c0_13] : memref<128x128xf32, #tpu.memory_space<vmem>>, vector<128x128xf32>
    %cst_14 = arith.constant dense<0.000000e+00> : vector<128x128xf32>
    %16 = tpu.matmul %14, %15, %cst_14 {dimension_numbers = #tpu.dot_dimension_numbers<[1], [0], [0], [1], [0, 0, 1, 1], [], []>} : vector<128x128xf32>, vector<128x128xf32>, vector<128x128xf32> -> vector<128x128xf32>
    %c0_15 = arith.constant 0 : index
    %c0_16 = arith.constant 0 : index
    %17 = vector.load %arg7[%c0_15, %c0_16] : memref<1x128xf32, #tpu.memory_space<vmem>>, vector<1x128xf32>
    %18 = vector.broadcast %17 : vector<1x128xf32> to vector<128x128xf32>
    %19 = arith.addf %16, %18 : vector<128x128xf32>
    %c0_17 = arith.constant 0 : index
    %c0_18 = arith.constant 0 : index
    %20 = vector.load %arg8[%c0_17, %c0_18] : memref<128x128xf32, #tpu.memory_space<vmem>>, vector<128x128xf32>
    tpu.vector_store %arg8[%c0_17, %c0_18], %19 {strides = array<i32>} : memref<128x128xf32, #tpu.memory_space<vmem>>, vector<128x128xf32>,
    return
  }
  func.func @transform_0(%arg0: i32) -> (i32, i32) {
    %c0_i32 = arith.constant 0 : i32
    %c0_i32_0 = arith.constant 0 : i32
    return %arg0, %c0_i32 : i32, i32
  }
  func.func @transform_1(%arg0: i32) -> (i32, i32) {
    %c0_i32 = arith.constant 0 : i32
    %c0_i32_0 = arith.constant 0 : i32
    %c0_i32_1 = arith.constant 0 : i32
    return %c0_i32, %c0_i32_0 : i32, i32
  }
  func.func @transform_2(%arg0: i32) -> (i32, i32) {
    %c0_i32 = arith.constant 0 : i32
    %c0_i32_0 = arith.constant 0 : i32
    %c0_i32_1 = arith.constant 0 : i32
    return %c0_i32, %c0_i32_0 : i32, i32
  }
  func.func @transform_3(%arg0: i32) -> (i32, i32) {
    %c0_i32 = arith.constant 0 : i32
    %c0_i32_0 = arith.constant 0 : i32
    %c0_i32_1 = arith.constant 0 : i32
    return %c0_i32, %c0_i32_0 : i32, i32
  }
  func.func @transform_4(%arg0: i32) -> (i32, i32) {
    %c0_i32 = arith.constant 0 : i32
    %c0_i32_0 = arith.constant 0 : i32
    %c0_i32_1 = arith.constant 0 : i32
    return %c0_i32, %c0_i32_0 : i32, i32
  }
  func.func @transform_5(%arg0: i32) -> (i32, i32) {
    %c0_i32 = arith.constant 0 : i32
    %c0_i32_0 = arith.constant 0 : i32
    %c0_i32_1 = arith.constant 0 : i32
    return %c0_i32, %c0_i32_0 : i32, i32
  }
  func.func @transform_6(%arg0: i32) -> (i32, i32) {
    %c0_i32 = arith.constant 0 : i32
    %c0_i32_0 = arith.constant 0 : i32
    %c0_i32_1 = arith.constant 0 : i32
    return %c0_i32, %c0_i32_0 : i32, i32
  }
  func.func @transform_7(%arg0: i32) -> (i32, i32) {
    %c0_i32 = arith.constant 0 : i32
    %c0_i32_0 = arith.constant 0 : i32
    return %arg0, %c0_i32 : i32, i32
  }
}

</mosaic_0001>

<bundles_post_ra>
// kernel: _lambda_.1
= control target key start
LH: loop header
LB: loop body
LE: loop exit
PB: predicated region body
PF: predicated region fallthrough
CT: control target
= control target key end

     0   :  { %s1250_s24 = smov 0   ;;  %s1434_s0 = inlined_call_operand.vmem [shape: f32[256,4], index: 0, kind: input, shape index: {}]   ;;  %s1435_s1 = inlined_call_operand.vmem [shape: f32[4,128], index: 1, kind: input, shape index: {}]   ;;  %s1436_s2 = inlined_call_operand.vmem [shape: f32[1,128], index: 2, kind: input, shape index: {}]   ;;  %s1437_s3 = inlined_call_operand.vmem [shape: f32[128,128], index: 3, kind: input, shape index: {}]   ;;  %s1438_s4 = inlined_call_operand.vmem [shape: f32[1,128], index: 4, kind: input, shape index: {}]   ;;  %s1439_s5 = inlined_call_operand.vmem [shape: f32[128,128], index: 5, kind: input, shape index: {}]   ;;  %s1440_s6 = inlined_call_operand.vmem [shape: f32[1,128], index: 6, kind: input, shape index: {}]   ;;  %s1441_s7 = inlined_call_operand.vmem [shape: f32[256,128], index: 7, kind: output, shape index: {}]  }
   0x1 LB: > { %s944_s25 = sadd.s32 4294967295, %s1208_s24   ;;  %p948_p0 = scmp.ge.s32.totalorder %s1208_s24, 1  ;;  %s1208_s24 = sphi %s1250_s24, %s17_s24  }
   0x2   : > { %p238_p1 = scmp.lt.s32.totalorder %s1208_s24, 3 }
   0x4   : > { %p239_p2 = pnand %p948_p0, %p238_p1 }
   0x5   : > { %s949_s28 = sshll.u32 (!%p239_p2), %s944_s25, 4 }
   0x6   : > { %242 = sbr.rel (%p239_p2) target bundleno = 642 (0x282), region = 48  ;;  %p271_p3 = scmp.lt.s32.totalorder (!%p239_p2), %s949_s28, 31 }
   0xb   : > { %v298_v0 = vld [vmem:[%s1435_s1] sm:$0xf]  ;;  %vm355_vm0 = vcmask 1043456   ;;  %v535_v1 = vld [vmem:[%s1437_s3 + $0x78] sm:$0xff]  ;;  %v534_v2 = vld [vmem:[%s1437_s3 + $0x70] sm:$0xff]  ;;  %s1443_s28 = smov (!%p271_p3, %s949_s28), 31 }
   0xc   : > { %1056 = vmatprep.subr.msk.mxu0 %vm355_vm0, %v298_v0  ;;  %1082 = vmatprep.subr.mxu1 %v535_v1  ;;  %v533_v3 = vld [vmem:[%s1437_s3 + $0x68] sm:$0xff]  ;;  %v532_v4 = vld [vmem:[%s1437_s3 + $0x60] sm:$0xff]  ;;  %s950_s14 = sshll.u32 %s1443_s28, 3  ;;  %vm306_vm1 = vcmask 31744   ;;  %v531_v5 = vld [vmem:[%s1437_s3 + $0x58] sm:$0xff] }
   0xd   : > { %1057 = vmatpush3.msk.msra.mxu0 %vm355_vm0, %v298_v0  ;;  %1083 = vmatpush3.msra.mxu1 %v535_v1  ;;  %s1281_s17 = scalar_lea.vmem %s1434_s0, %s950_s14  ;;  %v530_v9 = vld [vmem:[%s1437_s3 + $0x50] sm:$0xff]  ;;  %v529_v11 = vld [vmem:[%s1437_s3 + $0x48] sm:$0xff]  ;;  %v528_v13 = vld [vmem:[%s1437_s3 + $0x40] sm:$0xff]  ;;  %s1413_s22 = scalar_lea.vmem %s1441_s7, %s950_s14 }
   0xe   : > { %1084 = vmatprep.subr.mxu1 %v534_v2  ;;  %v282_v6 = vld [vmem:[%s1281_s17] sm:$0xff]  ;;  %v283_v7 = vld [vmem:[%s1281_s17 + $0x8] sm:$0xff]  ;;  %v284_v8 = vld [vmem:[%s1281_s17 + $0x10] sm:$0xff] }
   0xf   : > { %1085 = vmatpush3.msra.mxu1 %v534_v2  ;;  %1058 = vmatprep.mubr.msk.f32.mxu0 %vm306_vm1, %v282_v6  ;;  %v285_v10 = vld [vmem:[%s1281_s17 + $0x18] sm:$0xff]  ;;  %v286_v12 = vld [vmem:[%s1281_s17 + $0x20] sm:$0xff]  ;;  %v287_v14 = vld [vmem:[%s1281_s17 + $0x28] sm:$0xff] }
  0x10   : > { %1086 = vmatprep.subr.mxu1 %v533_v3  ;;  %1059 = vmatmul.mubr.msk.f32.vlgmr.msra.gmra.mxu0 %vm306_vm1, %v283_v7  ;;  %v527_v15 = vld [vmem:[%s1437_s3 + $0x38] sm:$0xff]  ;;  %v288_v16 = vld [vmem:[%s1281_s17 + $0x30] sm:$0xff]  ;;  %v525_v19 = vld [vmem:[%s1437_s3 + $0x28] sm:$0xff] }
  0x11   : > { %1087 = vmatpush3.msra.mxu1 %v533_v3  ;;  %1061 = vmatprep.mubr.msk.f32.mxu0 %vm306_vm1, %v284_v8  ;;  %v526_v17 = vld [vmem:[%s1437_s3 + $0x30] sm:$0xff]  ;;  %v289_v18 = vld [vmem:[%s1281_s17 + $0x38] sm:$0xff]  ;;  %v290_v20 = vld [vmem:[%s1281_s17 + $0x40] sm:$0xff] }
  0x12   : > { %1088 = vmatprep.subr.mxu1 %v532_v4  ;;  %v524_v21 = vld [vmem:[%s1437_s3 + $0x20] sm:$0xff]  ;;  %v291_v22 = vld [vmem:[%s1281_s17 + $0x48] sm:$0xff]  ;;  %v292_v23 = vld [vmem:[%s1281_s17 + $0x50] sm:$0xff] }
  0x13   : > { %1089 = vmatpush3.msra.mxu1 %v532_v4  ;;  %v293_v24 = vld [vmem:[%s1281_s17 + $0x58] sm:$0xff]  ;;  %v294_v25 = vld [vmem:[%s1281_s17 + $0x60] sm:$0xff]  ;;  %v295_v26 = vld [vmem:[%s1281_s17 + $0x68] sm:$0xff] }
  0x14   : > { %1090 = vmatprep.subr.mxu1 %v531_v5  ;;  %1062 = vmatmul.mubr.msk.f32.gmra.mxu0 %vm306_vm1, %v285_v10  ;;  %v296_v27 = vld [vmem:[%s1281_s17 + $0x70] sm:$0xff]  ;;  %v297_v28 = vld [vmem:[%s1281_s17 + $0x78] sm:$0xff]  ;;  %v521_v31 = vld [vmem:[%s1437_s3 + $0x8] sm:$0xff] }
  0x15   : > { %1091 = vmatpush3.msra.mxu1 %v531_v5  ;;  %1064 = vmatprep.mubr.msk.f32.mxu0 %vm306_vm1, %v286_v12  ;;  %v523_v29 = vld [vmem:[%s1437_s3 + $0x18] sm:$0xff]  ;;  %v522_v30 = vld [vmem:[%s1437_s3 + $0x10] sm:$0xff]  ;;  %v520_v32 = vld [vmem:[%s1437_s3] sm:$0xff] }
  0x16   : > { %1092 = vmatprep.subr.mxu1 %v530_v9  ;;  %v719_v33 = vld [vmem:[%s1439_s5 + $0x78] sm:$0xff]  ;;  %v718_v34 = vld [vmem:[%s1439_s5 + $0x70] sm:$0xff]  ;;  %v717_v35 = vld [vmem:[%s1439_s5 + $0x68] sm:$0xff] }
  0x17   : > { %1093 = vmatpush3.msra.mxu1 %v530_v9  ;;  %1138 = vmatprep.subr.mxu0 %v719_v33  ;;  %v716_v36 = vld [vmem:[%s1439_s5 + $0x60] sm:$0xff]  ;;  %v715_v37 = vld [vmem:[%s1439_s5 + $0x58] sm:$0xff]  ;;  %v714_v38 = vld [vmem:[%s1439_s5 + $0x50] sm:$0xff] }
  0x18   : > { %1094 = vmatprep.subr.mxu1 %v529_v11  ;;  %1065 = vmatmul.mubr.msk.f32.gmra.mxu0 %vm306_vm1, %v287_v14  ;;  %v713_v39 = vld [vmem:[%s1439_s5 + $0x48] sm:$0xff]  ;;  %v712_v40 = vld [vmem:[%s1439_s5 + $0x40] sm:$0xff]  ;;  %v711_v41 = vld [vmem:[%s1439_s5 + $0x38] sm:$0xff] }
  0x19   : > { %1095 = vmatpush3.msra.mxu1 %v529_v11  ;;  %1067 = vmatprep.mubr.msk.f32.mxu0 %vm306_vm1, %v288_v16  ;;  %v710_v42 = vld [vmem:[%s1439_s5 + $0x30] sm:$0xff]  ;;  %v709_v43 = vld [vmem:[%s1439_s5 + $0x28] sm:$0xff]  ;;  %v708_v44 = vld [vmem:[%s1439_s5 + $0x20] sm:$0xff] }
  0x1a   : > { %1096 = vmatprep.subr.mxu1 %v528_v13  ;;  %1139 = vmatpush3.msra.mxu0 %v719_v33  ;;  %v707_v45 = vld [vmem:[%s1439_s5 + $0x18] sm:$0xff]  ;;  %v953_v46 = vld [vmem:[%s1436_s2] ss:$0 sm:$0xff] }
  0x1b   : > { %1097 = vmatpush3.msra.mxu1 %v528_v13  ;;  %1140 = vmatprep.subr.mxu0 %v718_v34  ;;  %v704_v33 = vld [vmem:[%s1439_s5] sm:$0xff] }
  0x1c   : > { %1098 = vmatprep.subr.mxu1 %v527_v15  ;;  %1068 = vmatmul.mubr.msk.f32.gmra.mxu0 %vm306_vm1, %v289_v18 }
  0x1d   : > { %1099 = vmatpush3.msra.mxu1 %v527_v15  ;;  %1070 = vmatprep.mubr.msk.f32.mxu0 %vm306_vm1, %v290_v20 }
  0x1e   : > { %1100 = vmatprep.subr.mxu1 %v526_v17  ;;  %1141 = vmatpush3.msra.mxu0 %v718_v34  ;;  %v971_v34 = vld [vmem:[%s1438_s4] ss:$0 sm:$0xff] }
  0x1f   : > { %1101 = vmatpush3.msra.mxu1 %v526_v17  ;;  %1142 = vmatprep.subr.mxu0 %v717_v35 }
  0x20   : > { %1102 = vmatprep.subr.mxu1 %v525_v19  ;;  %1071 = vmatmul.mubr.msk.f32.gmra.mxu0 %vm306_vm1, %v291_v22 }
  0x21   : > { %1103 = vmatpush3.msra.mxu1 %v525_v19  ;;  %1073 = vmatprep.mubr.msk.f32.mxu0 %vm306_vm1, %v292_v23 }
  0x22   : > { %1104 = vmatprep.subr.mxu1 %v524_v21  ;;  %1143 = vmatpush3.msra.mxu0 %v717_v35 }
  0x23   : > { %1105 = vmatpush3.msra.mxu1 %v524_v21  ;;  %1144 = vmatprep.subr.mxu0 %v716_v36 }
  0x24   : > { %1074 = vmatmul.mubr.msk.f32.gmra.mxu0 %vm306_vm1, %v293_v24  ;;  %1106 = vmatprep.subr.mxu1 %v523_v29 }
  0x25   : > { %1076 = vmatprep.mubr.msk.f32.mxu0 %vm306_vm1, %v294_v25  ;;  %1107 = vmatpush3.msra.mxu1 %v523_v29 }
  0x26   : > { %1108 = vmatprep.subr.mxu1 %v522_v30  ;;  %1145 = vmatpush3.msra.mxu0 %v716_v36 }
  0x27   : > { %1109 = vmatpush3.msra.mxu1 %v522_v30  ;;  %1146 = vmatprep.subr.mxu0 %v715_v37 }
  0x28   : > { %1077 = vmatmul.mubr.msk.f32.gmra.mxu0 %vm306_vm1, %v295_v26  ;;  %1110 = vmatprep.subr.mxu1 %v521_v31 }
  0x29   : > { %1079 = vmatprep.mubr.msk.f32.mxu0 %vm306_vm1, %v296_v27  ;;  %1111 = vmatpush3.msra.mxu1 %v521_v31  ;;  %v706_v31 = vld [vmem:[%s1439_s5 + $0x10] sm:$0xff] }
  0x2a   : > { %1112 = vmatprep.subr.mxu1 %v520_v32  ;;  %1147 = vmatpush3.msra.mxu0 %v715_v37 }
  0x2b   : > { %1113 = vmatpush3.msra.mxu1 %v520_v32  ;;  %1148 = vmatprep.subr.mxu0 %v714_v38  ;;  %v705_v32 = vld [vmem:[%s1439_s5 + $0x8] sm:$0xff] }
  0x2c   : > { %1080 = vmatmul.mubr.msk.f32.gmra.mxu0 %vm306_vm1, %v297_v28 }
  0x2d   : > { %1149 = vmatpush3.msra.mxu0 %v714_v38 }
  0x2e   : > { %1150 = vmatprep.subr.mxu0 %v713_v39 }
  0x2f   : > { %1151 = vmatpush3.msra.mxu0 %v713_v39 }
  0x30   : > { %1152 = vmatprep.subr.mxu0 %v712_v40 }
  0x31   : > { %1153 = vmatpush3.msra.mxu0 %v712_v40 }
  0x32   : > { %1154 = vmatprep.subr.mxu0 %v711_v41 }
  0x33   : > { %1155 = vmatpush3.msra.mxu0 %v711_v41 }
  0x34   : > { %1156 = vmatprep.subr.mxu0 %v710_v42 }
  0x35   : > { %1157 = vmatpush3.msra.mxu0 %v710_v42 }
  0x36   : > { %1158 = vmatprep.subr.mxu0 %v709_v43 }
  0x37   : > { %1159 = vmatpush3.msra.mxu0 %v709_v43 }
  0x38   : > { %1160 = vmatprep.subr.mxu0 %v708_v44 }
  0x39   : > { %1161 = vmatpush3.msra.mxu0 %v708_v44 }
  0x3a   : > { %1162 = vmatprep.subr.mxu0 %v707_v45 }
  0x3b   : > { %1163 = vmatpush3.msra.mxu0 %v707_v45 }
  0x3c   : > { %1164 = vmatprep.subr.mxu0 %v706_v31 }
  0x3d   : > { %1165 = vmatpush3.msra.mxu0 %v706_v31 }
  0x3e   : > { %1166 = vmatprep.subr.mxu0 %v705_v32 }
  0x3f   : > { %1167 = vmatpush3.msra.mxu0 %v705_v32 }
  0x40   : > { %1168 = vmatprep.subr.mxu0 %v704_v33 }
  0x41   : > { %1169 = vmatpush3.msra.mxu0 %v704_v33 }
  0xd0   : > { %v1060_v47 = vpop.f32.mrf.mxu0 }
  0xd1   : > { %v431_v48 = vadd.f32 %v1060_v47, %v953_v46 }
  0xd2   : > { %v425_v49 = vpop.f32.mrf.mxu0 }
  0xd3   : > { %v426_v50 = vadd.f32 %v953_v46, %v425_v49  ;;  %v505_v53 = vmax.f32 %v431_v48, 0.0 }
  0xd4   : > { %v1063_v51 = vpop.f32.mrf.mxu0 }
  0xd5   : > { %v504_v52 = vmax.f32 %v426_v50, 0.0  ;;  %v441_v54 = vadd.f32 %v1063_v51, %v953_v46 }
  0xd6   : > { %v435_v55 = vpop.f32.mrf.mxu0 }
  0xd7   : > { %v436_v56 = vadd.f32 %v953_v46, %v435_v55  ;;  %1114 = vmatprep.mubr.f32.mxu1 %v504_v52  ;;  %v507_v59 = vmax.f32 %v441_v54, 0.0 }
  0xd8   : > { %v1066_v57 = vpop.f32.mrf.mxu0  ;;  %1115 = vmatmul.mubr.f32.vlgmr.msra.gmra.mxu1 %v505_v53 }
  0xd9   : > { %v506_v58 = vmax.f32 %v436_v56, 0.0  ;;  %v451_v60 = vadd.f32 %v1066_v57, %v953_v46 }
  0xda   : > { %v445_v61 = vpop.f32.mrf.mxu0 }
  0xdb   : > { %v446_v62 = vadd.f32 %v953_v46, %v445_v61  ;;  %1117 = vmatprep.mubr.f32.mxu1 %v506_v58  ;;  %v509_v1 = vmax.f32 %v451_v60, 0.0 }
  0xdc   : > { %v1069_v63 = vpop.f32.mrf.mxu0  ;;  %1118 = vmatmul.mubr.f32.gmra.mxu1 %v507_v59 }
  0xdd   : > { %v508_v0 = vmax.f32 %v446_v62, 0.0  ;;  %v461_v2 = vadd.f32 %v1069_v63, %v953_v46 }
  0xde   : > { %v455_v3 = vpop.f32.mrf.mxu0 }
  0xdf   : > { %v456_v4 = vadd.f32 %v953_v46, %v455_v3  ;;  %1120 = vmatprep.mubr.f32.mxu1 %v508_v0  ;;  %v511_v7 = vmax.f32 %v461_v2, 0.0 }
  0xe0   : > { %v1072_v5 = vpop.f32.mrf.mxu0  ;;  %1121 = vmatmul.mubr.f32.gmra.mxu1 %v509_v1 }
  0xe1   : > { %v510_v6 = vmax.f32 %v456_v4, 0.0  ;;  %v471_v8 = vadd.f32 %v1072_v5, %v953_v46 }
  0xe2   : > { %v465_v9 = vpop.f32.mrf.mxu0 }
  0xe3   : > { %v466_v10 = vadd.f32 %v953_v46, %v465_v9  ;;  %1123 = vmatprep.mubr.f32.mxu1 %v510_v6  ;;  %v513_v13 = vmax.f32 %v471_v8, 0.0 }
  0xe4   : > { %v1075_v11 = vpop.f32.mrf.mxu0  ;;  %1124 = vmatmul.mubr.f32.gmra.mxu1 %v511_v7 }
  0xe5   : > { %v512_v12 = vmax.f32 %v466_v10, 0.0  ;;  %v481_v14 = vadd.f32 %v1075_v11, %v953_v46 }
  0xe6   : > { %v475_v15 = vpop.f32.mrf.mxu0 }
  0xe7   : > { %v476_v16 = vadd.f32 %v953_v46, %v475_v15  ;;  %1126 = vmatprep.mubr.f32.mxu1 %v512_v12  ;;  %v515_v19 = vmax.f32 %v481_v14, 0.0 }
  0xe8   : > { %v1078_v17 = vpop.f32.mrf.mxu0  ;;  %1127 = vmatmul.mubr.f32.gmra.mxu1 %v513_v13 }
  0xe9   : > { %v514_v18 = vmax.f32 %v476_v16, 0.0  ;;  %v491_v20 = vadd.f32 %v1078_v17, %v953_v46 }
  0xea   : > { %v485_v21 = vpop.f32.mrf.mxu0 }
  0xeb   : > { %v486_v22 = vadd.f32 %v953_v46, %v485_v21  ;;  %1129 = vmatprep.mubr.f32.mxu1 %v514_v18  ;;  %v517_v25 = vmax.f32 %v491_v20, 0.0 }
  0xec   : > { %v1081_v23 = vpop.f32.mrf.mxu0  ;;  %1130 = vmatmul.mubr.f32.gmra.mxu1 %v515_v19  ;;  %v972_v19 = vld [vmem:[%s1440_s6] ss:$0 sm:$0xff] }
  0xed   : > { %v516_v24 = vmax.f32 %v486_v22, 0.0  ;;  %v501_v26 = vadd.f32 %v1081_v23, %v953_v46 }
  0xee   : > { %v495_v27 = vpop.f32.mrf.mxu0 }
  0xef   : > { %v496_v28 = vadd.f32 %v953_v46, %v495_v27  ;;  %1132 = vmatprep.mubr.f32.mxu1 %v516_v24  ;;  %v519_v30 = vmax.f32 %v501_v26, 0.0 }
  0xf0   : > { %1133 = vmatmul.mubr.f32.gmra.mxu1 %v517_v25 }
  0xf1   : > { %v518_v29 = vmax.f32 %v496_v28, 0.0 }
  0xf3   : > { %1135 = vmatprep.mubr.f32.mxu1 %v518_v29 }
  0xf4   : > { %1136 = vmatmul.mubr.f32.gmra.mxu1 %v519_v30 }
 0x198   : > { %v1116_v35 = vpop.f32.mrf.mxu1 }
 0x199   : > { %v615_v36 = vadd.f32 %v1116_v35, %v971_v34 }
 0x19a   : > { %v609_v37 = vpop.f32.mrf.mxu1 }
 0x19b   : > { %v610_v38 = vadd.f32 %v971_v34, %v609_v37  ;;  %v689_v41 = vmax.f32 %v615_v36, 0.0 }
 0x19c   : > { %v1119_v39 = vpop.f32.mrf.mxu1 }
 0x19d   : > { %v688_v40 = vmax.f32 %v610_v38, 0.0  ;;  %v625_v42 = vadd.f32 %v1119_v39, %v971_v34 }
 0x19e   : > { %v619_v43 = vpop.f32.mrf.mxu1 }
 0x19f   : > { %v620_v44 = vadd.f32 %v971_v34, %v619_v43  ;;  %1170 = vmatprep.mubr.f32.mxu0 %v688_v40  ;;  %v691_v47 = vmax.f32 %v625_v42, 0.0 }
 0x1a0   : > { %v1122_v45 = vpop.f32.mrf.mxu1  ;;  %1171 = vmatmul.mubr.f32.vlgmr.msra.gmra.mxu0 %v689_v41 }
 0x1a1   : > { %v690_v46 = vmax.f32 %v620_v44, 0.0  ;;  %v635_v48 = vadd.f32 %v1122_v45, %v971_v34 }
 0x1a2   : > { %v629_v49 = vpop.f32.mrf.mxu1 }
 0x1a3   : > { %v630_v50 = vadd.f32 %v971_v34, %v629_v49  ;;  %1173 = vmatprep.mubr.f32.mxu0 %v690_v46  ;;  %v693_v53 = vmax.f32 %v635_v48, 0.0 }
 0x1a4   : > { %v1125_v51 = vpop.f32.mrf.mxu1  ;;  %1174 = vmatmul.mubr.f32.gmra.mxu0 %v691_v47 }
 0x1a5   : > { %v692_v52 = vmax.f32 %v630_v50, 0.0  ;;  %v645_v54 = vadd.f32 %v1125_v51, %v971_v34 }
 0x1a6   : > { %v639_v55 = vpop.f32.mrf.mxu1 }
 0x1a7   : > { %v640_v56 = vadd.f32 %v971_v34, %v639_v55  ;;  %1176 = vmatprep.mubr.f32.mxu0 %v692_v52  ;;  %v695_v59 = vmax.f32 %v645_v54, 0.0 }
 0x1a8   : > { %v1128_v57 = vpop.f32.mrf.mxu1  ;;  %1177 = vmatmul.mubr.f32.gmra.mxu0 %v693_v53 }
 0x1a9   : > { %v694_v58 = vmax.f32 %v640_v56, 0.0  ;;  %v655_v60 = vadd.f32 %v1128_v57, %v971_v34 }
 0x1aa   : > { %v649_v61 = vpop.f32.mrf.mxu1 }
 0x1ab   : > { %v650_v62 = vadd.f32 %v971_v34, %v649_v61  ;;  %1179 = vmatprep.mubr.f32.mxu0 %v694_v58  ;;  %v697_v1 = vmax.f32 %v655_v60, 0.0 }
 0x1ac   : > { %v1131_v63 = vpop.f32.mrf.mxu1  ;;  %1180 = vmatmul.mubr.f32.gmra.mxu0 %v695_v59 }
 0x1ad   : > { %v696_v0 = vmax.f32 %v650_v62, 0.0  ;;  %v665_v2 = vadd.f32 %v1131_v63, %v971_v34 }
 0x1ae   : > { %v659_v3 = vpop.f32.mrf.mxu1 }
 0x1af   : > { %v660_v4 = vadd.f32 %v971_v34, %v659_v3  ;;  %1182 = vmatprep.mubr.f32.mxu0 %v696_v0  ;;  %v699_v7 = vmax.f32 %v665_v2, 0.0 }
 0x1b0   : > { %v1134_v5 = vpop.f32.mrf.mxu1  ;;  %1183 = vmatmul.mubr.f32.gmra.mxu0 %v697_v1 }
 0x1b1   : > { %v698_v6 = vmax.f32 %v660_v4, 0.0  ;;  %v675_v8 = vadd.f32 %v1134_v5, %v971_v34 }
 0x1b2   : > { %v669_v9 = vpop.f32.mrf.mxu1 }
 0x1b3   : > { %v670_v10 = vadd.f32 %v971_v34, %v669_v9  ;;  %1185 = vmatprep.mubr.f32.mxu0 %v698_v6  ;;  %v701_v13 = vmax.f32 %v675_v8, 0.0 }
 0x1b4   : > { %v1137_v11 = vpop.f32.mrf.mxu1  ;;  %1186 = vmatmul.mubr.f32.gmra.mxu0 %v699_v7 }
 0x1b5   : > { %v700_v12 = vmax.f32 %v670_v10, 0.0  ;;  %v685_v14 = vadd.f32 %v1137_v11, %v971_v34 }
 0x1b6   : > { %v679_v15 = vpop.f32.mrf.mxu1 }
 0x1b7   : > { %v680_v16 = vadd.f32 %v971_v34, %v679_v15  ;;  %1188 = vmatprep.mubr.f32.mxu0 %v700_v12  ;;  %v703_v18 = vmax.f32 %v685_v14, 0.0 }
 0x1b8   : > { %1189 = vmatmul.mubr.f32.gmra.mxu0 %v701_v13 }
 0x1b9   : > { %v702_v17 = vmax.f32 %v680_v16, 0.0 }
 0x1bb   : > { %1191 = vmatprep.mubr.f32.mxu0 %v702_v17 }
 0x1bc   : > { %1192 = vmatmul.mubr.f32.gmra.mxu0 %v703_v18 }
 0x260   : > { %v1172_v20 = vpop.f32.mrf.mxu0 }
 0x261   : > { %v799_v21 = vadd.f32 %v1172_v20, %v972_v19 }
 0x262   : > { %v793_v22 = vpop.f32.mrf.mxu0 }
 0x263   : > { %873 = vst [vmem:[%s1413_s22 + $0x8] sm:$0xff] %v799_v21  ;;  %v794_v23 = vadd.f32 %v972_v19, %v793_v22 }
 0x264   : > { %v1175_v24 = vpop.f32.mrf.mxu0 }
 0x265   : > { %872 = vst [vmem:[%s1413_s22] sm:$0xff] %v794_v23  ;;  %v809_v25 = vadd.f32 %v1175_v24, %v972_v19 }
 0x266   : > { %v803_v26 = vpop.f32.mrf.mxu0 }
 0x267   : > { %875 = vst [vmem:[%s1413_s22 + $0x18] sm:$0xff] %v809_v25  ;;  %v804_v27 = vadd.f32 %v972_v19, %v803_v26 }
 0x268   : > { %v1178_v28 = vpop.f32.mrf.mxu0 }
 0x269   : > { %874 = vst [vmem:[%s1413_s22 + $0x10] sm:$0xff] %v804_v27  ;;  %v819_v29 = vadd.f32 %v1178_v28, %v972_v19 }
 0x26a   : > { %v813_v30 = vpop.f32.mrf.mxu0 }
 0x26b   : > { %877 = vst [vmem:[%s1413_s22 + $0x28] sm:$0xff] %v819_v29  ;;  %v814_v31 = vadd.f32 %v972_v19, %v813_v30 }
 0x26c   : > { %v1181_v32 = vpop.f32.mrf.mxu0 }
 0x26d   : > { %876 = vst [vmem:[%s1413_s22 + $0x20] sm:$0xff] %v814_v31  ;;  %v829_v33 = vadd.f32 %v1181_v32, %v972_v19 }
 0x26e   : > { %v823_v34 = vpop.f32.mrf.mxu0 }
 0x26f   : > { %879 = vst [vmem:[%s1413_s22 + $0x38] sm:$0xff] %v829_v33  ;;  %v824_v35 = vadd.f32 %v972_v19, %v823_v34 }
 0x270   : > { %v1184_v36 = vpop.f32.mrf.mxu0 }
 0x271   : > { %878 = vst [vmem:[%s1413_s22 + $0x30] sm:$0xff] %v824_v35  ;;  %v839_v37 = vadd.f32 %v1184_v36, %v972_v19 }
 0x272   : > { %v833_v38 = vpop.f32.mrf.mxu0 }
 0x273   : > { %881 = vst [vmem:[%s1413_s22 + $0x48] sm:$0xff] %v839_v37  ;;  %v834_v39 = vadd.f32 %v972_v19, %v833_v38 }
 0x274   : > { %v1187_v40 = vpop.f32.mrf.mxu0 }
 0x275   : > { %880 = vst [vmem:[%s1413_s22 + $0x40] sm:$0xff] %v834_v39  ;;  %v849_v41 = vadd.f32 %v1187_v40, %v972_v19 }
 0x276   : > { %v843_v42 = vpop.f32.mrf.mxu0 }
 0x277   : > { %883 = vst [vmem:[%s1413_s22 + $0x58] sm:$0xff] %v849_v41  ;;  %v844_v43 = vadd.f32 %v972_v19, %v843_v42 }
 0x278   : > { %v1190_v44 = vpop.f32.mrf.mxu0 }
 0x279   : > { %882 = vst [vmem:[%s1413_s22 + $0x50] sm:$0xff] %v844_v43  ;;  %v859_v45 = vadd.f32 %v1190_v44, %v972_v19 }
 0x27a   : > { %v853_v46 = vpop.f32.mrf.mxu0 }
 0x27b   : > { %885 = vst [vmem:[%s1413_s22 + $0x68] sm:$0xff] %v859_v45  ;;  %v854_v47 = vadd.f32 %v972_v19, %v853_v46 }
 0x27c   : > { %v1193_v48 = vpop.f32.mrf.mxu0 }
 0x27d   : > { %884 = vst [vmem:[%s1413_s22 + $0x60] sm:$0xff] %v854_v47  ;;  %v869_v49 = vadd.f32 %v1193_v48, %v972_v19 }
 0x27e   : > { %v863_v50 = vpop.f32.mrf.mxu0 }
 0x27f   : > { %887 = vst [vmem:[%s1413_s22 + $0x78] sm:$0xff] %v869_v49  ;;  %v864_v51 = vadd.f32 %v972_v19, %v863_v50 }
 0x281   : > { %886 = vst [vmem:[%s1413_s22 + $0x70] sm:$0xff] %v864_v51 }
 0x282 PF: > { %s17_s24 = sadd.s32 1, %s1208_s24  }
 0x283   : > { %p14_p4 = scmp.ge.s32.totalorder %s17_s24, 4  }
 0x285   :  { %16 = sbr.rel (!%p14_p4) target bundleno = 1 (0x1), region = 78 }

</bundles_post_ra>
